<compile_context>
chip_gen: v5e
topology: v5e:2x2
jax: 0.10.0
libtpu: 0.0.40
codegen_flags: <defaults>
</compile_context>

<pallas_src>
import functools

import jax
import jax.numpy as jnp
from jax import lax
from jax.experimental import pallas as pl
from jax.experimental.pallas import tpu as pltpu


def _round_up(n, m):
    return ((n + m - 1) // m) * m


def _region_self_attn_kernel(*refs, dh_p, has_amask):
    if has_amask:
        (x_ref, kpmb_ref, amask_ref, w3_ref, b3_ref,
         wo_ref, bo_ref, o_ref, acc_ref) = refs
    else:
        (x_ref, kpmb_ref, w3_ref, b3_ref,
         wo_ref, bo_ref, o_ref, acc_ref) = refs
        amask_ref = None

    h = pl.program_id(1)
    n_heads = pl.num_programs(1)

    @pl.when(h == 0)
    def _():
        acc_ref[...] = jnp.zeros_like(acc_ref)

    x = x_ref[...]                                                     # (Tp, E) bf16

    # Per-head fused Q|K|V projection (scaling already folded into the Q columns).
    qkv = jnp.dot(x, w3_ref[...],
                  preferred_element_type=jnp.float32) + b3_ref[...]    # (Tp, 3*Dh_p) f32

    # Lane-aligned static slices (dh_p is a multiple of 128).
    q = qkv[:, :dh_p].astype(jnp.bfloat16)                             # (Tp, Dh_p)
    k = qkv[:, dh_p:2 * dh_p].astype(jnp.bfloat16)                     # (Tp, Dh_p)
    v = qkv[:, 2 * dh_p:].astype(jnp.bfloat16)                         # (Tp, Dh_p)

    # Scores: contract over the (zero-padded) head dim; f32 accumulation.
    s = lax.dot_general(q, k, (((1,), (1,)), ((), ())),
                        preferred_element_type=jnp.float32)            # (Tp, Tp) f32
    s = s + kpmb_ref[...]                                              # (1, Tp) broadcast
    if amask_ref is not None:
        s = s + amask_ref[...]                                         # (Tp, Tp)

    # Softmax in f32, reciprocal on the EUP.
    m = jnp.max(s, axis=-1, keepdims=True)
    p = jnp.exp(s - m)
    denom = jnp.sum(p, axis=-1, keepdims=True)
    p = p * pl.reciprocal(denom, approx=True)

    o = jnp.dot(p.astype(jnp.bfloat16), v,
                preferred_element_type=jnp.float32)                    # (Tp, Dh_p) f32

    # Per-head slice of the output projection (padded Wo rows are zero), accumulated
    # across the head grid axis in f32 scratch.
    acc_ref[...] += jnp.dot(o.astype(jnp.bfloat16), wo_ref[...],
                            preferred_element_type=jnp.float32)        # (Tp, E) f32

    @pl.when(h == n_heads - 1)
    def _():
        o_ref[...] = (acc_ref[...] + bo_ref[...]).astype(o_ref.dtype)


def transformer_encoder_layer_region(region_img_features, region_img_mask, params,
                                     attn_mask=None, *, num_heads):
    """region_img_features: (T, B, E) f32 (seq-major, fairseq convention).
       region_img_mask:     (B, T) bool/0-1, True/1 = padded key position.
       attn_mask:           optional (T, T) bool/0-1, True/1 = masked out.
       Returns (T, B, E) f32."""
    T, B, E = region_img_features.shape
    assert E % num_heads == 0
    H = num_heads
    Dh = E // H
    Dh_p = _round_up(Dh, 128)          # lane-dense head dim (zero-padded in the weights)
    scaling = Dh ** -0.5

    # Pad sequence (sublane axis) to a multiple of 8; padded keys masked via kpm bias,
    # padded query rows sliced off at the end.
    Tp = _round_up(T, 8)
    pad = Tp - T

    x = jnp.transpose(region_img_features, (1, 0, 2))                  # (B, T, E)
    x = jnp.pad(x, ((0, 0), (0, pad), (0, 0))).astype(jnp.bfloat16)    # (B, Tp, E) bf16

    # Key-padding additive bias (finite -1e9; padded extra keys also masked).
    kpmb = jnp.where(region_img_mask.astype(bool),
                     jnp.float32(-1e9), jnp.float32(0.0))               # (B, T)
    kpmb = jnp.pad(kpmb, ((0, 0), (0, pad)), constant_values=-1e9)      # (B, Tp)
    kpmb = kpmb.reshape(B, 1, Tp)

    has_amask = attn_mask is not None
    if has_amask:
        amask = jnp.where(attn_mask.astype(bool),
                          jnp.float32(-1e8), jnp.float32(0.0))
        amask = jnp.pad(amask, ((0, pad), (0, pad)))                    # (Tp, Tp)

    # --- head-major, lane-padded weights (built once in the wrapper) ---
    # Fold 1/sqrt(Dh) into the Q weight & bias columns.
    wq = params["wq"] * jnp.float32(scaling)
    bq = params["bq"] * jnp.float32(scaling)
    wk, bk = params["wk"], params["bk"]
    wv, bv = params["wv"], params["bv"]
    wo, bo = params["wo"], params["bo"]

    def split_w(w):   # (E, E) -> (H, E, Dh_p), zero-padded columns
        w = w.reshape(E, H, Dh).transpose(1, 0, 2)                      # (H, E, Dh)
        return jnp.pad(w, ((0, 0), (0, 0), (0, Dh_p - Dh)))

    def split_b(b):   # (1, E) -> (H, 1, Dh_p), zero-padded columns
        b = b.reshape(1, H, Dh).transpose(1, 0, 2)                      # (H, 1, Dh)
        return jnp.pad(b, ((0, 0), (0, 0), (0, Dh_p - Dh)))

    w3 = jnp.concatenate([split_w(wq), split_w(wk), split_w(wv)],
                         axis=2).astype(jnp.bfloat16)                   # (H, E, 3*Dh_p) bf16
    b3 = jnp.concatenate([split_b(bq), split_b(bk), split_b(bv)],
                         axis=2).astype(jnp.float32)                    # (H, 1, 3*Dh_p) f32

    wo_h = wo.reshape(H, Dh, E)                                         # rows split per head
    wo_h = jnp.pad(wo_h, ((0, 0), (0, Dh_p - Dh), (0, 0))).astype(jnp.bfloat16)  # (H, Dh_p, E)
    bo = bo.astype(jnp.float32)                                         # (1, E)

    kernel = functools.partial(_region_self_attn_kernel, dh_p=Dh_p, has_amask=has_amask)

    idx_b = lambda b, h: (b, 0, 0)       # per-batch blocks (constant across heads)
    idx_h = lambda b, h: (h, 0, 0)       # per-head weight blocks
    idx_c = lambda b, h: (0, 0)          # grid-invariant blocks

    in_specs = [
        pl.BlockSpec((None, Tp, E), idx_b),            # x
        pl.BlockSpec((None, 1, Tp), idx_b),            # key-padding additive bias
    ]
    inputs = [x, kpmb]
    if has_amask:
        in_specs.append(pl.BlockSpec((Tp, Tp), idx_c))  # attn-mask additive bias
        inputs.append(amask)
    in_specs += [
        pl.BlockSpec((None, E, 3 * Dh_p), idx_h),      # fused per-head W_qkv
        pl.BlockSpec((None, 1, 3 * Dh_p), idx_h),      # fused per-head b_qkv
        pl.BlockSpec((None, Dh_p, E), idx_h),          # per-head W_o rows
        pl.BlockSpec((1, E), idx_c),                   # b_o
    ]
    inputs += [w3, b3, wo_h, bo]

    flops = int(B * H * (2 * Tp * E * 3 * Dh_p        # fused QKV projection
                         + 4 * Tp * Tp * Dh_p         # scores + P@V
                         + 2 * Tp * Dh_p * E))        # per-head output projection
    transcendentals = int(B * H * Tp * Tp)
    bytes_accessed = int(B * Tp * E * 2                # x
                         + B * Tp * 4                  # kpm bias
                         + B * H * (E * 3 * Dh_p + Dh_p * E) * 2   # weights per step
                         + H * 3 * Dh_p * 4 + E * 4    # biases
                         + B * Tp * E * 2              # bf16 output
                         + (Tp * Tp * 4 if has_amask else 0))

    out = pl.pallas_call(
        kernel,
        out_shape=jax.ShapeDtypeStruct((B, Tp, E), jnp.bfloat16),
        grid_spec=pltpu.PrefetchScalarGridSpec(
            num_scalar_prefetch=0,
            grid=(B, H),
            in_specs=in_specs,
            out_specs=pl.BlockSpec((None, Tp, E), idx_b),
            scratch_shapes=[pltpu.VMEM((Tp, E), jnp.float32)],
        ),
        compiler_params=pltpu.CompilerParams(
            dimension_semantics=("parallel", "arbitrary"),
            # 48 MiB: leaves headroom on v7x (64 MiB physical per TC), conservative on
            # v5e/v6e (128 MiB).  The per-step working set is bounded by design.
            vmem_limit_bytes=48 * 1024 * 1024,
        ),
        cost_estimate=pl.CostEstimate(flops=flops,
                                      transcendentals=transcendentals,
                                      bytes_accessed=bytes_accessed),
    )(*inputs)

    out = out[:, :T, :]                                    # drop padded query rows (bf16)
    out = jnp.transpose(out, (1, 0, 2)).astype(jnp.float32)  # back to (T, B, E) f32
    return out


def _xavier_uniform(key, shape, gain=1.0):
    fan_in, fan_out = shape
    a = gain * (6.0 / (fan_in + fan_out)) ** 0.5
    return jax.random.uniform(key, shape, jnp.float32, -a, a)


def init_params(key, E):
    ks = jax.random.split(key, 8)
    g = 2.0 ** -0.5   # fairseq gain for q/k/v when qkv share the embed dim
    # Weights stored as (in, out): kernel computes x @ W + b.
    # Biases are random (instead of fairseq's zeros) so the self-check exercises them.
    return {
        "wq": _xavier_uniform(ks[0], (E, E), gain=g), "bq": 0.02 * jax.random.normal(ks[4], (1, E), jnp.float32),
        "wk": _xavier_uniform(ks[1], (E, E), gain=g), "bk": 0.02 * jax.random.normal(ks[5], (1, E), jnp.float32),
        "wv": _xavier_uniform(ks[2], (E, E), gain=g), "bv": 0.02 * jax.random.normal(ks[6], (1, E), jnp.float32),
        "wo": _xavier_uniform(ks[3], (E, E)),         "bo": 0.02 * jax.random.normal(ks[7], (1, E), jnp.float32),
    }


def _reference(x_tbe, key_padding_mask, params, num_heads, attn_mask=None):
    """Pure-JAX reference mirroring the PyTorch module (eval) and the kernel's
    bf16-input / f32-accumulation quantization."""
    T, B, E = x_tbe.shape
    Dh = E // num_heads
    f32 = jnp.float32
    x = jnp.transpose(x_tbe, (1, 0, 2)).astype(jnp.bfloat16)           # (B, T, E)

    wq = params["wq"].astype(jnp.bfloat16)
    wk = params["wk"].astype(jnp.bfloat16)
    wv = params["wv"].astype(jnp.bfloat16)
    wo = params["wo"].astype(jnp.bfloat16)

    q = jnp.dot(x, wq, preferred_element_type=f32) + params["bq"]
    q = q * (Dh ** -0.5)
    k = jnp.dot(x, wk, preferred_element_type=f32) + params["bk"]
    v = jnp.dot(x, wv, preferred_element_type=f32) + params["bv"]

    def heads(t):
        return t.reshape(B, T, num_heads, Dh).astype(jnp.bfloat16)

    qh, kh, vh = heads(q), heads(k), heads(v)
    s = jnp.einsum("bthd,bshd->bhts", qh, kh, preferred_element_type=f32)
    s = s + (key_padding_mask.astype(f32) * -1e9)[:, None, None, :]
    if attn_mask is not None:
        s = s + jnp.where(attn_mask.astype(bool), f32(-1e8), f32(0.0))[None, None, :, :]
    p = jax.nn.softmax(s, axis=-1)
    o = jnp.einsum("bhts,bshd->bthd", p.astype(jnp.bfloat16), vh,
                   preferred_element_type=f32)
    o = o.reshape(B, T, E).astype(jnp.bfloat16)
    out = jnp.dot(o, wo, preferred_element_type=f32) + params["bo"]
    return jnp.transpose(out, (1, 0, 2))


if __name__ == "__main__":
    # Small region-attention shapes: seq=13 (exercises sublane padding to 16),
    # batch=2 (parallel grid axis), embed=32, heads=4 (Dh=8 padded to 128 lanes).
    T, B, E, H = 13, 2, 32, 4
    key = jax.random.PRNGKey(0)
    kx, kp = jax.random.split(key, 2)

    region_img_features = jax.random.normal(kx, (T, B, E), jnp.float32)        # (seq, batch, embed)
    region_img_mask = jnp.zeros((B, T), jnp.bool_).at[1, -3:].set(True)        # True = padded region

    params = init_params(kp, E)

    # --- path 1: attn_mask=None (specialized kernel, no mask operand) ---
    out = transformer_encoder_layer_region(
        region_img_features, region_img_mask, params, attn_mask=None, num_heads=H)
    out = jax.block_until_ready(out)
    assert out.shape == (T, B, E)
    ref = _reference(region_img_features, region_img_mask, params, H, attn_mask=None)
    # Tolerance accounts for bf16 MXU inputs, bf16 output store and the approximate
    # EUP reciprocal.
    assert jnp.allclose(out, ref, atol=5e-2, rtol=5e-2), float(jnp.max(jnp.abs(out - ref)))

    # --- path 2: with an attention mask (banded local attention) ---
    ii = jnp.arange(T)
    attn_mask = (jnp.abs(ii[:, None] - ii[None, :]) > 6)
    out_m = transformer_encoder_layer_region(
        region_img_features, region_img_mask, params, attn_mask=attn_mask, num_heads=H)
    out_m = jax.block_until_ready(out_m)
    ref_m = _reference(region_img_features, region_img_mask, params, H, attn_mask=attn_mask)
    assert jnp.allclose(out_m, ref_m, atol=5e-2, rtol=5e-2), float(jnp.max(jnp.abs(out_m - ref_m)))

    print("KERNEL_OK")
</pallas_src>

<mosaic_0001>
module attributes {stable_mosaic.version = 11 : i64} {
  func.func @_region_self_attn_kernel(%arg0: i32, %arg1: i32, %arg2: memref<1x16x32xbf16, #tpu.memory_space<vmem>>, %arg3: memref<1x1x16xf32, #tpu.memory_space<vmem>>, %arg4: memref<1x32x384xbf16, #tpu.memory_space<vmem>>, %arg5: memref<1x1x384xf32, #tpu.memory_space<vmem>>, %arg6: memref<1x128x32xbf16, #tpu.memory_space<vmem>>, %arg7: memref<1x32xf32, #tpu.memory_space<vmem>>, %arg8: memref<1x16x32xbf16, #tpu.memory_space<vmem>>, %arg9: memref<16x32xf32, #tpu.memory_space<vmem>>) attributes {dimension_semantics = [#tpu.dimension_semantics<parallel>, #tpu.dimension_semantics<arbitrary>], iteration_bounds = array<i64: 2, 4>, scalar_prefetch = 0 : i64, scratch_operands = 1 : i64, tpu.core_type = #tpu.core_type<tc>, window_params = [{transform_indices = @transform_0, window_bounds = array<i64: 1, 16, 32>}, {transform_indices = @transform_1, window_bounds = array<i64: 1, 1, 16>}, {transform_indices = @transform_2, window_bounds = array<i64: 1, 32, 384>}, {transform_indices = @transform_3, window_bounds = array<i64: 1, 1, 384>}, {transform_indices = @transform_4, window_bounds = array<i64: 1, 128, 32>}, {pipeline_mode = #tpu.pipeline_mode<synchronous>, transform_indices = @transform_5, window_bounds = array<i64: 1, 32>}, {transform_indices = @transform_6, window_bounds = array<i64: 1, 16, 32>}]} {
    %c0_i32 = arith.constant 0 : i32
    %0 = arith.cmpi eq, %arg1, %c0_i32 : i32
    %1 = arith.extui %0 : i1 to i32
    %c0_i32_0 = arith.constant 0 : i32
    %2 = arith.cmpi ne, %1, %c0_i32_0 : i32
    scf.if %2 {
      %cst_25 = arith.constant 0.000000e+00 : f32
      %45 = vector.broadcast %cst_25 : f32 to vector<16x32xf32>
      %c0_26 = arith.constant 0 : index
      %c0_27 = arith.constant 0 : index
      %46 = vector.load %arg9[%c0_26, %c0_27] : memref<16x32xf32, #tpu.memory_space<vmem>>, vector<16x32xf32>
      tpu.vector_store %arg9[%c0_26, %c0_27], %45 {strides = array<i32>} : memref<16x32xf32, #tpu.memory_space<vmem>>, vector<16x32xf32>,
    } else {
    }
    %c0 = arith.constant 0 : index
    %c0_1 = arith.constant 0 : index
    %c0_2 = arith.constant 0 : index
    %3 = vector.load %arg2[%c0, %c0_1, %c0_2] : memref<1x16x32xbf16, #tpu.memory_space<vmem>>, vector<1x16x32xbf16>
    %4 = vector.shape_cast %3 : vector<1x16x32xbf16> to vector<16x32xbf16>
    %c0_3 = arith.constant 0 : index
    %c0_4 = arith.constant 0 : index
    %c0_5 = arith.constant 0 : index
    %5 = vector.load %arg4[%c0_3, %c0_4, %c0_5] : memref<1x32x384xbf16, #tpu.memory_space<vmem>>, vector<1x32x384xbf16>
    %6 = vector.shape_cast %5 : vector<1x32x384xbf16> to vector<32x384xbf16>
    %cst = arith.constant dense<0.000000e+00> : vector<16x384xf32>
    %7 = tpu.matmul %4, %6, %cst {dimension_numbers = #tpu.dot_dimension_numbers<[1], [0], [0], [1], [0, 0, 1, 1], [], []>} : vector<16x32xbf16>, vector<32x384xbf16>, vector<16x384xf32> -> vector<16x384xf32>
    %c0_6 = arith.constant 0 : index
    %c0_7 = arith.constant 0 : index
    %c0_8 = arith.constant 0 : index
    %8 = vector.load %arg5[%c0_6, %c0_7, %c0_8] : memref<1x1x384xf32, #tpu.memory_space<vmem>>, vector<1x1x384xf32>
    %9 = vector.shape_cast %8 : vector<1x1x384xf32> to vector<1x384xf32>
    %10 = vector.broadcast %9 : vector<1x384xf32> to vector<16x384xf32>
    %11 = arith.addf %7, %10 : vector<16x384xf32>
    %12 = vector.extract_strided_slice %11 {offsets = [0, 0], sizes = [16, 128], strides = [1, 1]} : vector<16x384xf32> to vector<16x128xf32>
    %13 = arith.truncf %12 : vector<16x128xf32> to vector<16x128xbf16>
    %14 = vector.extract_strided_slice %11 {offsets = [0, 128], sizes = [16, 128], strides = [1, 1]} : vector<16x384xf32> to vector<16x128xf32>
    %15 = arith.truncf %14 : vector<16x128xf32> to vector<16x128xbf16>
    %16 = vector.extract_strided_slice %11 {offsets = [0, 256], sizes = [16, 128], strides = [1, 1]} : vector<16x384xf32> to vector<16x128xf32>
    %17 = arith.truncf %16 : vector<16x128xf32> to vector<16x128xbf16>
    %cst_9 = arith.constant dense<0.000000e+00> : vector<16x16xf32>
    %18 = tpu.matmul %13, %15, %cst_9 {dimension_numbers = #tpu.dot_dimension_numbers<[1], [1], [0], [0], [0, 0, 1, 0], [], []>} : vector<16x128xbf16>, vector<16x128xbf16>, vector<16x16xf32> -> vector<16x16xf32>
    %c0_10 = arith.constant 0 : index
    %c0_11 = arith.constant 0 : index
    %c0_12 = arith.constant 0 : index
    %19 = vector.load %arg3[%c0_10, %c0_11, %c0_12] : memref<1x1x16xf32, #tpu.memory_space<vmem>>, vector<1x1x16xf32>
    %20 = vector.shape_cast %19 : vector<1x1x16xf32> to vector<1x16xf32>
    %21 = vector.broadcast %20 : vector<1x16xf32> to vector<16x16xf32>
    %22 = arith.addf %18, %21 : vector<16x16xf32>
    %cst_13 = arith.constant dense<0xFF800000> : vector<16xf32>
    %23 = vector.multi_reduction <maximumf>, %22, %cst_13 [1] : vector<16x16xf32> to vector<16xf32>
    %24 = vector.shape_cast %23 : vector<16xf32> to vector<16x1xf32>
    %25 = vector.broadcast %24 : vector<16x1xf32> to vector<16x16xf32>
    %26 = arith.subf %22, %25 : vector<16x16xf32>
    %27 = math.exp %26 : vector<16x16xf32>
    %cst_14 = arith.constant dense<0.000000e+00> : vector<16xf32>
    %28 = vector.multi_reduction <add>, %27, %cst_14 [1] : vector<16x16xf32> to vector<16xf32>
    %29 = vector.shape_cast %28 : vector<16xf32> to vector<16x1xf32>
    %30 = tpu.reciprocal %29 {approx = true} : vector<16x1xf32> -> vector<16x1xf32>
    %31 = vector.broadcast %30 : vector<16x1xf32> to vector<16x16xf32>
    %32 = arith.mulf %27, %31 : vector<16x16xf32>
    %33 = arith.truncf %32 : vector<16x16xf32> to vector<16x16xbf16>
    %cst_15 = arith.constant dense<0.000000e+00> : vector<16x128xf32>
    %34 = tpu.matmul %33, %17, %cst_15 {dimension_numbers = #tpu.dot_dimension_numbers<[1], [0], [0], [1], [0, 0, 1, 1], [], []>} : vector<16x16xbf16>, vector<16x128xbf16>, vector<16x128xf32> -> vector<16x128xf32>
    %c0_16 = arith.constant 0 : index
    %c0_17 = arith.constant 0 : index
    %35 = vector.load %arg9[%c0_16, %c0_17] : memref<16x32xf32, #tpu.memory_space<vmem>>, vector<16x32xf32>
    %36 = arith.truncf %34 : vector<16x128xf32> to vector<16x128xbf16>
    %c0_18 = arith.constant 0 : index
    %c0_19 = arith.constant 0 : index
    %c0_20 = arith.constant 0 : index
    %37 = vector.load %arg6[%c0_18, %c0_19, %c0_20] : memref<1x128x32xbf16, #tpu.memory_space<vmem>>, vector<1x128x32xbf16>
    %38 = vector.shape_cast %37 : vector<1x128x32xbf16> to vector<128x32xbf16>
    %cst_21 = arith.constant dense<0.000000e+00> : vector<16x32xf32>
    %39 = tpu.matmul %36, %38, %cst_21 {dimension_numbers = #tpu.dot_dimension_numbers<[1], [0], [0], [1], [0, 0, 1, 1], [], []>} : vector<16x128xbf16>, vector<128x32xbf16>, vector<16x32xf32> -> vector<16x32xf32>
    %40 = arith.addf %35, %39 : vector<16x32xf32>
    %c0_22 = arith.constant 0 : index
    %c0_23 = arith.constant 0 : index
    %41 = vector.load %arg9[%c0_22, %c0_23] : memref<16x32xf32, #tpu.memory_space<vmem>>, vector<16x32xf32>
    tpu.vector_store %arg9[%c0_22, %c0_23], %40 {strides = array<i32>} : memref<16x32xf32, #tpu.memory_space<vmem>>, vector<16x32xf32>,
    %c3_i32 = arith.constant 3 : i32
    %42 = arith.cmpi eq, %arg1, %c3_i32 : i32
    %43 = arith.extui %42 : i1 to i32
    %c0_i32_24 = arith.constant 0 : i32
    %44 = arith.cmpi ne, %43, %c0_i32_24 : i32
    scf.if %44 {
      %c0_25 = arith.constant 0 : index
      %c0_26 = arith.constant 0 : index
      %45 = vector.load %arg9[%c0_25, %c0_26] : memref<16x32xf32, #tpu.memory_space<vmem>>, vector<16x32xf32>
      %c0_27 = arith.constant 0 : index
      %c0_28 = arith.constant 0 : index
      %46 = vector.load %arg7[%c0_27, %c0_28] : memref<1x32xf32, #tpu.memory_space<vmem>>, vector<1x32xf32>
      %47 = vector.broadcast %46 : vector<1x32xf32> to vector<16x32xf32>
      %48 = arith.addf %45, %47 : vector<16x32xf32>
      %49 = arith.truncf %48 : vector<16x32xf32> to vector<16x32xbf16>
      %c0_29 = arith.constant 0 : index
      %c0_30 = arith.constant 0 : index
      %c0_31 = arith.constant 0 : index
      %50 = vector.load %arg8[%c0_29, %c0_30, %c0_31] : memref<1x16x32xbf16, #tpu.memory_space<vmem>>, vector<1x16x32xbf16>
      %51 = vector.shape_cast %50 : vector<1x16x32xbf16> to vector<16x32xbf16>
      %52 = vector.shape_cast %49 : vector<16x32xbf16> to vector<1x16x32xbf16>
      tpu.vector_store %arg8[%c0_29, %c0_30, %c0_31], %52 {strides = array<i32>} : memref<1x16x32xbf16, #tpu.memory_space<vmem>>, vector<1x16x32xbf16>,
    } else {
    }
    return
  }
  func.func @transform_0(%arg0: i32, %arg1: i32) -> (i32, i32, i32) {
    %c0_i32 = arith.constant 0 : i32
    %c0_i32_0 = arith.constant 0 : i32
    %c0_i32_1 = arith.constant 0 : i32
    return %arg0, %c0_i32, %c0_i32_0 : i32, i32, i32
  }
  func.func @transform_1(%arg0: i32, %arg1: i32) -> (i32, i32, i32) {
    %c0_i32 = arith.constant 0 : i32
    %c0_i32_0 = arith.constant 0 : i32
    %c0_i32_1 = arith.constant 0 : i32
    return %arg0, %c0_i32, %c0_i32_0 : i32, i32, i32
  }
  func.func @transform_2(%arg0: i32, %arg1: i32) -> (i32, i32, i32) {
    %c0_i32 = arith.constant 0 : i32
    %c0_i32_0 = arith.constant 0 : i32
    %c0_i32_1 = arith.constant 0 : i32
    return %arg1, %c0_i32, %c0_i32_0 : i32, i32, i32
  }
  func.func @transform_3(%arg0: i32, %arg1: i32) -> (i32, i32, i32) {
    %c0_i32 = arith.constant 0 : i32
    %c0_i32_0 = arith.constant 0 : i32
    %c0_i32_1 = arith.constant 0 : i32
    return %arg1, %c0_i32, %c0_i32_0 : i32, i32, i32
  }
  func.func @transform_4(%arg0: i32, %arg1: i32) -> (i32, i32, i32) {
    %c0_i32 = arith.constant 0 : i32
    %c0_i32_0 = arith.constant 0 : i32
    %c0_i32_1 = arith.constant 0 : i32
    return %arg1, %c0_i32, %c0_i32_0 : i32, i32, i32
  }
  func.func @transform_5(%arg0: i32, %arg1: i32) -> (i32, i32) {
    %c0_i32 = arith.constant 0 : i32
    %c0_i32_0 = arith.constant 0 : i32
    %c0_i32_1 = arith.constant 0 : i32
    return %c0_i32, %c0_i32_0 : i32, i32
  }
  func.func @transform_6(%arg0: i32, %arg1: i32) -> (i32, i32, i32) {
    %c0_i32 = arith.constant 0 : i32
    %c0_i32_0 = arith.constant 0 : i32
    %c0_i32_1 = arith.constant 0 : i32
    return %arg0, %c0_i32, %c0_i32_0 : i32, i32, i32
  }
}

</mosaic_0001>

<bundles_post_ra>
// kernel: tpu_custom_call.1
= control target key start
LH: loop header
LB: loop body
LE: loop exit
PB: predicated region body
PF: predicated region fallthrough
CT: control target
= control target key end

     0   :  { %11 = vsyncpa [#allocation4], 0  ;;  %s1251_s0 = inlined_call_operand.vmem [shape: bf16[2,16,32], index: 0, kind: input, shape index: {}]   ;;  %s1252_s1 = inlined_call_operand.vmem [shape: f32[2,1,16], index: 1, kind: input, shape index: {}]   ;;  %s1253_s2 = inlined_call_operand.vmem [shape: bf16[4,32,384], index: 2, kind: input, shape index: {}]   ;;  %s1254_s3 = inlined_call_operand.vmem [shape: f32[4,1,384], index: 3, kind: input, shape index: {}]   ;;  %s1255_s4 = inlined_call_operand.vmem [shape: bf16[4,128,32], index: 4, kind: input, shape index: {}]   ;;  %s1256_s5 = inlined_call_operand.vmem [shape: f32[1,32], index: 5, kind: input, shape index: {}]   ;;  %s1257_s6 = inlined_call_operand.hbm [shape: bf16[2,16,32], index: 6, kind: output, shape index: {}]  }
   0x1   :  { %13 = vsyncpa [#allocation4 + $0x1], 0  ;;  %s1060_s21 = smov 0   ;;  %s1062_s22 = smov 0  }
   0x2   :  { %s1064_s23 = smov 0   ;;  %s1066_s24 = smov 0  }
   0x3   :  { %s1068_s25 = smov 0   ;;  %s1070_s26 = smov 0  }
   0x4   :  { %s1072_s27 = smov 0   ;;  %s1074_s28 = smov 0  }
   0x5 LB: > { %1267 = sst [smem:[#allocation6_spill]] %s992_s21  ;;  %s740_s29 = sadd.s32 4294967295, %s1020_s28   ;;  %s1020_s28 = sphi %s1074_s28, %s19_s28   ;;  %s1016_s27 = sphi %s1072_s27, %s1287_s27   ;;  %s1012_s26 = sphi %s1070_s26, %s1286_s26   ;;  %s1008_s25 = sphi %s1068_s25, %s1285_s25   ;;  %s1004_s24 = sphi %s1066_s24, %s1290_s24   ;;  %s1000_s23 = sphi %s1064_s23, %s1283_s23   ;;  %s996_s22 = sphi %s1062_s22, %s1289_s22   ;;  %s992_s21 = sphi %s1060_s21, %s1288_s21  }
   0x6   : > { %1268 = sst [smem:[#allocation7_spill]] %s1000_s23  ;;  %s741_s30 = sadd.s32 4294967294, %s1020_s28  }
   0x7   : > { %1269 = sst [smem:[#allocation8_spill]] %s1012_s26  ;;  %s28_s7 = sadd.s32 1, %s1012_s26 }
   0x8   : > { %1270 = sst [smem:[#allocation9_spill]] %s1016_s27  ;;  %p29_p0 = scmp.ge.s32.totalorder %s28_s7, 4 }
   0x9   : > { %1271 = sst [smem:[#allocation10_spill]] %s1020_s28  ;;  %s31_s8 = sadd.s32 1, %s1016_s27 }
   0xa   : > { %p199_p1 = scmp.ne.s32.totalorder %s1000_s23, %s996_s22  ;;  %p200_p2 = scmp.eq.s32.totalorder %s740_s29, 7 }
   0xb   : > { %s1292_s7 = smov (%p29_p0, %s28_s7), 0  ;;  %s1294_s8 = smov (!%p29_p0, %s31_s8), %s1016_s27 }
   0xc   : > { %1272 = sst [smem:[#allocation11_spill]] %s1292_s7  ;;  %p1109_p3 = por %p200_p2, %p199_p1 }
   0xd   : > { %p205_p4 = scmp.ne.s32.totalorder %s996_s22, %s992_s21  ;;  %p33_p5 = scmp.ge.s32.totalorder %s1294_s8, 2 }
   0xe   : > { %p206_p6 = scmp.eq.s32.totalorder %s741_s30, 7  ;;  %p744_p7 = scmp.ge.s32.totalorder %s1020_s28, 1 }
   0xf   : > { %p264_p8 = scmp.lt.s32.totalorder %s1020_s28, 9  ;;  %s1296_s8 = smov (%p33_p5, %s1294_s8), 0 }
  0x10   : > { %1274 = sst [smem:[#allocation12_spill]] %s1296_s8  ;;  %p1119_p9 = por %p206_p6, %p205_p4 }
  0x11   : > { %p265_p10 = pnand %p744_p7, %p264_p8  ;;  %s186_s11 = ssub.s32 %s1016_s27, %s1296_s8 }
  0x12   : > { %s1275_s10 = scalar_select %p1119_p9, 1, 0 }
  0x13   : > { %s189_s12 = sadd.s32 1, %s1000_s23  ;;  %p187_p11 = scmp.eq.s32.totalorder %s186_s11, 0 }
  0x14   : > { %1276 = sst [smem:[#allocation13_spill]] %s1275_s10  ;;  %268 = sbr.rel (%p265_p10) target bundleno = 901 (0x385), region = 44 }
  0x15   : > { %s1127_s13 = scalar_select %p187_p11, %s1000_s23, %s189_s12  }
  0x16   : > { %s1261_s14 = sand.u32 (!%p265_p10), 1, %s996_s22   ;;  %p311_p12 = scmp.lt.s32.totalorder (!%p265_p10), %s1008_s25, 1 }
  0x17   : > { %1277 = sst [smem:[#allocation14_spill]] %s1127_s13  ;;  %s745_s15 = sshll.u32 (!%p265_p10), %s1261_s14, 3 }
  0x18   : > { %p319_p13 = scmp.lt.s32.totalorder (!%p265_p10), %s1004_s24, 3  ;;  %s1161_s30 = scalar_lea.vmem (!%p265_p10), [#allocation3], %s745_s15 }
  0x19   : > { %s1135_s16 = scalar_select %p311_p12, %s1008_s25, 1 }
  0x1a   : > { %s320_s17 = scalar_select %p319_p13, %s1004_s24, 3 }
  0x1b   : > { %s822_s18 = sshll.u32 %s1135_s16, 3  ;;  %s318_s29 = scalar_lea.vmem %s1252_s1, %s1135_s16 }
  0x1c   : > { %s315_s12 = scalar_lea.vmem %s1251_s0, %s822_s18  ;;  %s840_s8 = smul.u32 48, %s320_s17 }
  0x1d   : > { %s841_s7 = smul.u32 3, %s320_s17  ;;  %s823_s27 = sshll.u32 %s320_s17, 6 }
  0x1e   : > { %s1149_s13 = scalar_lea.vmem %s1253_s2, %s840_s8  ;;  %s1154_s21 = scalar_lea.vmem %s1255_s4, %s823_s27 }
  0x1f   : > { %s1159_s20 = scalar_lea.vmem %s1254_s3, %s841_s7  ;;  %p751_p0 = scmp.ne.s32.totalorder %s1004_s24, 0 }
  0x21   : > { %337 = sbr.rel (%p751_p0) target bundleno = 41 (0x29), region = 48 }
  0x26   : > { %vm338_vm0 = vcmask 261120   ;;  %v1022_v0 = vmov 0.0  }
  0x27   : > { %339 = vst.msk [vmem:[#allocation2] sm:$0xff] %vm338_vm0, %v1022_v0 }
  0x28   : > { %340 = vst.msk [vmem:[#allocation2 + $0x8] sm:$0xff] %vm338_vm0, %v1022_v0 }
  0x29 PF: > { %v828_v1 = vld [vmem:[%s1149_s13 + $0x1c] sm:$0xf]  ;;  %v772_v2 = vld [vmem:[%s1149_s13 + $0x24] sm:$0xf0]  ;;  %v825_v3 = vld [vmem:[%s1149_s13 + $0x4] sm:$0xf] }
  0x2a   : > { %v775_v4 = vor.u32 %v828_v1, %v772_v2  ;;  %v760_v5 = vld [vmem:[%s1149_s13 + $0xc] sm:$0xf0]  ;;  %v770_v6 = vld [vmem:[%s1149_s13 + $0x18] sm:$0xf]  ;;  %v829_v7 = vld [vmem:[%s1149_s13 + $0x20] sm:$0xf0] }
  0x2b   : > { %v771_v8 = vor.u32 %v829_v7, %v770_v6  ;;  %v758_v9 = vld [vmem:[%s1149_s13] sm:$0xf]  ;;  %v826_v10 = vld [vmem:[%s1149_s13 + $0x8] sm:$0xf0]  ;;  %v763_v11 = vor.u32 %v825_v3, %v760_v5  ;;  %vm396_vm1 = vcmask 261120   ;;  %vm463_vm2 = vcmask 130048  }
  0x2c   : > { %420 = vmatpush.bf16.msra.mxu2 %v775_v4  ;;  %v759_v12 = vor.u32 %v826_v10, %v758_v9  ;;  %v824_v13 = vld [vmem:[%s315_s12] sm:$0xff]  ;;  %v830_v28 = vld [vmem:[%s1149_s13 + $0x28] sm:$0xf0]  ;;  %v766_v29 = vld [vmem:[%s1149_s13 + $0x8] sm:$0xf]  ;;  %p816_p1 = scmp.ne.s32.totalorder %s1004_s24, 3 }
  0x2d   : > { %406 = vmatpush.bf16.msra.mxu0 %v771_v8  ;;  %v351_v16 = vld [vmem:[%s1159_s20] sm:$0x7]  ;;  %v827_v31 = vld [vmem:[%s1149_s13 + $0x10] sm:$0xf0]  ;;  %v838_v56 = vld [vmem:[%s1154_s21 + $0x38] sm:$0xff] }
  0x2e   : > { %v354_v17 = vperm.slane %v351_v16, 1  ;;  %v353_v21 = vperm.slane %v351_v16, 0  ;;  %v778_v27 = vld [vmem:[%s1149_s13 + $0x20] sm:$0xf]  ;;  %v767_v32 = vor.u32 %v827_v31, %v766_v29  ;;  %v355_v44 = vperm.slane %v351_v16, 2  ;;  %571 = vmatpush.bf16.msra.mxu1 %v838_v56  ;;  %v837_v57 = vld [vmem:[%s1154_s21 + $0x30] sm:$0xff] }
  0x2f   : > { %v779_v30 = vor.u32 %v830_v28, %v778_v27  ;;  %v916_v33 = vld [vmem:[%s318_s29] ss:$0 sm:$0xff]  ;;  %v836_v58 = vld [vmem:[%s1154_s21 + $0x28] sm:$0xff]  ;;  %v834_v61 = vld [vmem:[%s1154_s21 + $0x18] sm:$0xff] }
  0x30   : > { %421 = vmatpush.bf16.msra.mxu2 %v763_v11  ;;  %v835_v59 = vld [vmem:[%s1154_s21 + $0x20] sm:$0xff]  ;;  %v833_v4 = vld [vmem:[%s1154_s21 + $0x10] sm:$0xff]  ;;  %v832_v5 = vld [vmem:[%s1154_s21 + $0x8] sm:$0xff] }
  0x31   : > { %407 = vmatpush.bf16.msra.mxu0 %v759_v12  ;;  %v831_v6 = vld [vmem:[%s1154_s21] sm:$0xff] }
  0x32   : > { %572 = vmatpush.bf16.msra.mxu1 %v837_v57  ;;  %v504_v10 = vld [vmem:[#allocation2] sm:$0xff] }
  0x33   : > { %781 = vmatmul.msk.bf16.vlgmr.msra.gmra.mxu2 %vm396_vm1, %v824_v13 }
  0x34   : > { %780 = vmatmul.msk.bf16.vlgmr.msra.gmra.mxu0 %vm396_vm1, %v824_v13  ;;  %434 = vmatpush.bf16.msrb.mxu2 %v779_v30 }
  0x36   : > { %573 = vmatpush.bf16.msra.mxu1 %v836_v58 }
  0x38   : > { %435 = vmatpush.bf16.msrb.mxu2 %v767_v32 }
  0x3a   : > { %574 = vmatpush.bf16.msra.mxu1 %v835_v59 }
  0x3e   : > { %575 = vmatpush.bf16.msra.mxu1 %v834_v61 }
  0x42   : > { %576 = vmatpush.bf16.msra.mxu1 %v833_v4 }
  0x43   : > { %782 = vmatmul.msk.bf16.vlgmr.msrb.gmra.mxu2 %vm396_vm1, %v824_v13  ;;  %v505_v13 = vld [vmem:[#allocation2 + $0x8] sm:$0xff] }
  0x46   : > { %577 = vmatpush.bf16.msra.mxu1 %v832_v5 }
  0x4a   : > { %578 = vmatpush.bf16.msra.mxu1 %v831_v6 }
  0xb1   : > { %v409_v15 = vpop.f32.mrf.mxu0 }
  0xb2   : > { %v410_v24 = vadd.f32 %v409_v15, %v353_v21 }
  0xb6   : > { %v423_v14 = vpop.f32.mrf.mxu2 }
  0xb7   : > { %v424_v19 = vadd.f32 %v423_v14, %v354_v17 }
  0xb9   : > { %v411_v22 = vpop.f32.mrf.mxu0 }
  0xba   : > { %v412_v25 = vadd.f32 %v411_v22, %v353_v21 }
  0xbc   : > { %v442_v26 = vpack.c.bf16 %v412_v25, %v410_v24 }
  0xbe   : > { %v425_v18 = vpop.f32.mrf.mxu2 }
  0xbf   : > { %v426_v20 = vadd.f32 %v425_v18, %v354_v17 }
  0xc1   : > { %v443_v23 = vpack.c.bf16 %v426_v20, %v424_v19 }
  0xc3   : > { %456 = vmatpush.bf16.xpose.msra.mxu3 %v443_v23 }
  0xc6   : > { %v437_v42 = vpop.f32.mrf.mxu2 }
  0xc7   : > { %v438_v47 = vadd.f32 %v437_v42, %v355_v44 }
  0xca   : > { %457 = vmatmul.bf16.vlgmr.msra.gmra.mxu3 %v442_v26 }
  0xce   : > { %v439_v48 = vpop.f32.mrf.mxu2 }
  0xcf   : > { %v440_v51 = vadd.f32 %v439_v48, %v355_v44 }
  0xd1   : > { %v444_v53 = vpack.c.bf16 %v440_v51, %v438_v47 }
  0xd3   : > { %497 = vmatpush.bf16.msrb.mxu0 %v444_v53 }
 0x14d   : > { %v458_v34 = vpop.f32.mrf.mxu3 }
 0x14e   : > { %v459_v35 = vadd.f32 %v916_v33, %v458_v34 }
 0x150   : > { %v464_v36 = vsel %vm463_vm2, %v459_v35, -inf }
 0x151   : > { %465 = vmax.xlane.f32.xlu0 %v464_v36 }
 0x155   : > { %v460_v37 = vpop.f32.mrf.mxu3 }
 0x156   : > { %v461_v38 = vadd.f32 %v916_v33, %v460_v37 }
 0x158   : > { %v467_v39 = vsel %vm463_vm2, %v461_v38, -inf }
 0x159   : > { %468 = vmax.xlane.f32.xlu0 %v467_v39 }
 0x1c4   : > { %v466_v40 = vpop.xlane.xlu0 %465 }
 0x1c5   : > { %v470_v41 = vsub.f32 %v459_v35, %v466_v40 }
 0x1c7   : > { %v472_v43 = vmul.f32 1.442695, %v470_v41 }
 0x1c9   : > { %917 = vpow2.f32 %v472_v43 }
 0x1cc   : > { %v469_v45 = vpop.xlane.xlu0 %468 }
 0x1cd   : > { %v471_v46 = vsub.f32 %v461_v38, %v469_v45 }
 0x1cf   : > { %v918_v49 = vpop.eup %917  ;;  %v474_v50 = vmul.f32 1.442695, %v471_v46 }
 0x1d0   : > { %v476_v52 = vsel %vm463_vm2, %v918_v49, 0.0 }
 0x1d1   : > { %919 = vpow2.f32 %v474_v50  ;;  %477 = vadd.xlane.f32.xlu1 %v476_v52 }
 0x1d7   : > { %v920_v54 = vpop.eup %919 }
 0x1d8   : > { %v479_v55 = vsel %vm463_vm2, %v920_v54, 0.0 }
 0x1d9   : > { %480 = vadd.xlane.f32.xlu1 %v479_v55 }
 0x244   : > { %v478_v60 = vpop.xlane.xlu1 %477 }
 0x245   : > { %921 = vrcp.f32 %v478_v60 }
 0x24b   : > { %v922_v63 = vpop.eup %921 }
 0x24c   : > { %v481_v62 = vpop.xlane.xlu1 %480  ;;  %v484_v1 = vmul.f32 %v922_v63, %v918_v49 }
 0x24d   : > { %923 = vrcp.f32 %v481_v62 }
 0x253   : > { %v924_v0 = vpop.eup %923 }
 0x254   : > { %v485_v2 = vmul.f32 %v924_v0, %v920_v54 }
 0x256   : > { %v486_v3 = vpack.c.bf16 %v485_v2, %v484_v1 }
 0x258   : > { %783 = vmatmul.msk.bf16.vlgmr.msrb.gmra.mxu0 %vm463_vm2, %v486_v3 }
 0x2d5   : > { %v499_v7 = vpop.f32.mrf.mxu0 }
 0x2dd   : > { %v501_v8 = vpop.f32.mrf.mxu0 }
 0x2de   : > { %v506_v9 = vpack.c.bf16 %v501_v8, %v499_v7 }
 0x2e0   : > { %579 = vmatmul.bf16.vlgmr.msra.gmra.mxu1 %v506_v9 }
 0x35d   : > { %v580_v11 = vpop.f32.mrf.mxu1 }
 0x35e   : > { %v585_v12 = vadd.f32 %v580_v11, %v504_v10 }
 0x360   : > { %587 = vst.msk [vmem:[#allocation2] sm:$0xff] %vm396_vm1, %v585_v12 }
 0x364   : > { %592 = sbr.rel (%p816_p1) target bundleno = 885 (0x375), region = 52 }
 0x365   : > { %v582_v14 = vpop.f32.mrf.mxu1 }
 0x366   : > { %v586_v15 = vadd.f32 %v582_v14, %v505_v13 }
 0x368   : > { %588 = vst.msk [vmem:[#allocation2 + $0x8] sm:$0xff] %vm396_vm1, %v586_v15 }
 0x369   : > { %v593_v16 = vld [vmem:[#allocation2] sm:$0xff]  ;;  %vm603_vm3 = vcmask 257024  }
 0x36a   : > { %v925_v17 = vld [vmem:[%s1256_s5] ss:$0 sm:$0xff] }
 0x36b   : > { %v599_v19 = vadd.f32 %v925_v17, %v593_v16 }
 0x36d   : > { %v601_v21 = vpack.c.bf16 %v599_v19, %v599_v19 }
 0x36f   : > { %v594_v18 = vld [vmem:[#allocation2 + $0x8] sm:$0xff]  ;;  %604 = vst.msk [vmem:[%s1161_s30] sm:$0xf] %vm603_vm3, %v601_v21 }
 0x370   : > { %v600_v20 = vadd.f32 %v925_v17, %v594_v18 }
 0x372   : > { %v602_v22 = vpack.c.bf16 %v600_v20, %v600_v20 }
 0x374   : > { %605 = vst.msk [vmem:[%s1161_s30 + $0x4] sm:$0xf] %vm603_vm3, %v602_v22 }
 0x375 PF: > { %s839_s24 = sshll.u32 %s1008_s25, 3  ;;  %s619_s10 = sshll.u32 %s1161_s30, 4  ;;  %s620_s10 = int_to_ptr.vmem [resolvable:$true] %s619_s10 }
 0x376   : > { %s618_s8 = scalar_lea.hbm %s1257_s6, %s839_s24  ;;  %s1278_s14 = sand.u32 1, %s996_s22  }
 0x377   : > { %s621_s13 = sshll.u32 %s618_s8, 4  ;;  %s607_s15 = scalar_lea.sflag [#allocation4], %s1278_s14  ;;  %s622_s13 = int_to_ptr.hbm [resolvable:$true] %s621_s13 }
 0x378   : > { %s940_s16 = sshra.s32 %s622_s13, 4  ;;  %s946_s25 = scalar_lea.hbm %s1257_s6, 16  ;;  %s941_s16 = int_to_ptr.hbm [resolvable:$true] %s940_s16 }
 0x379   : > { %s942_s17 = scalar_lea.hbm %s941_s16, 8  ;;  %p947_p6 = scmp.lt.s32.totalorder %s941_s16, %s1257_s6 }
 0x37a   : > { %p943_p2 = scmp.ne.s32.totalorder %s941_s16, %s942_s17  ;;  %p948_p7 = scmp.lt.s32.totalorder %s946_s25, %s942_s17 }
 0x37c   : > { %p944_p4 = pnand %p943_p2, %p1109_p3  ;;  %p949_p8 = por %p948_p7, %p947_p6 }
 0x37e   : > { %p945_p5 = pneg %p944_p4 }
 0x380   : > { %p950_p10 = pnand %p949_p8, %p945_p5 }
 0x382   : > { %953 = shalt.err (!%p950_p10)
}
 0x383   : > { %s1023_s19 = smov 64   ;;  %s1024_s20 = smov 4  }
 0x384   : > { %842 = dma.vmem_to_hbm [thread:$0]  (%p1109_p3), %s620_s10, 128, %s622_s13, %s607_s15, %s1023_s19, %s1023_s19, %s1024_s20  }
 0x385 PF: > { %s1279_s30 = sld [smem:[#allocation10_spill]] }
 0x386   : > { %s1280_s23 = sld [smem:[#allocation6_spill]] }
 0x38b   : > { %p848_p11 = scmp.ge.s32.totalorder %s1279_s30, 2 }
 0x38c   : > { %s636_s21 = sand.u32 1, %s1280_s23  }
 0x38d   : > { %p845_p12 = pnand %p848_p11, %p1119_p9  ;;  %s637_s27 = scalar_lea.sflag [#allocation4], %s636_s21 }
 0x38f   : > { %p846_p13 = pneg %p845_p12 }
 0x391   : > { %987 = dma.done.wait (%p846_p13), %s637_s27, 128  }
 0x392   : > { %989 = vsyncadd (%p846_p13), %s637_s27, 4294967168  ;;  %s19_s28 = sadd.s32 1, %s1279_s30   ;;  %s1282_s24 = sld [smem:[#allocation7_spill]] }
 0x393   : > { %p16_p0 = scmp.ge.s32.totalorder %s19_s28, 10   ;;  %s1283_s23 = sld [smem:[#allocation14_spill]] }
 0x394   : > { %s1284_s9 = sld [smem:[#allocation8_spill]]  ;;  %s1288_s21 = smov %s996_s22 }
 0x395   : > { %s1285_s25 = sld [smem:[#allocation9_spill]] }
 0x396   : > { %s1286_s26 = sld [smem:[#allocation11_spill]]  ;;  %18 = sbr.rel (!%p16_p0) target bundleno = 5 (0x5), region = 99 }
 0x397   : > { %s1287_s27 = sld [smem:[#allocation12_spill]] }
 0x398   : > { %s1289_s22 = smov %s1282_s24 }
 0x39a   : > { %s1290_s24 = smov %s1284_s9 }
 0x39b   :  { %643 = vsyncpa [#allocation4], 1 }
 0x39c   :  { %645 = vsyncpa [#allocation4 + $0x1], 1 }

</bundles_post_ra>
